<compile_context>
chip_gen: v5e
topology: v5e:2x2
jax: 0.10.0
libtpu: 0.0.40
codegen_flags: <defaults>
</compile_context>

<pallas_src>
import functools

import jax
import jax.numpy as jnp
from jax import lax
from jax.experimental import pallas as pl
from jax.experimental.pallas import tpu as pltpu


def _attn_proj_kernel(x_ref, wq_ref, wk_ref, wv_ref, wp_ref, bp_ref,
                      y_ref, stats_ref, acc_ref):
    """One (batch, head) grid step: per-head attention + projection accumulate.

    x_ref:     (N, C)   row tile for one batch element (compute dtype)
    wq/wk/wv:  (C, dh)  this head's QKV weight blocks (softmax scale folded in wq)
    wp_ref:    (dh, C)  this head's projection rows
    bp_ref:    (1, C)   projection bias (f32)
    y_ref:     (N, C)   pre-BN activations (f32), written at the last head
    stats_ref: (2, C)   row 0 = sum_r y[r,:], row 1 = sum_r (y[r,:]-tile_mean)^2
    acc_ref:   (N, C)   f32 VMEM scratch, persistent across the head axis
    """
    h = pl.program_id(1)

    @pl.when(h == 0)
    def _():
        acc_ref[...] = jnp.zeros_like(acc_ref)

    cdt = x_ref.dtype            # dtype fed to the MXU (f32 or bf16); acc stays f32
    x = x_ref[...]

    q = jnp.dot(x, wq_ref[...], preferred_element_type=jnp.float32)    # (N, dh)
    k = jnp.dot(x, wk_ref[...], preferred_element_type=jnp.float32)    # (N, dh)
    v = jnp.dot(x, wv_ref[...], preferred_element_type=jnp.float32)    # (N, dh)

    # Scores: contract the dh axis of q against the dh axis of k (no explicit k.T).
    s = lax.dot_general(q.astype(cdt), k.astype(cdt),
                        (((1,), (1,)), ((), ())),
                        preferred_element_type=jnp.float32)             # (N, N)
    s = s - jnp.max(s, axis=-1, keepdims=True)
    e = jnp.exp(s)                                                      # f32
    denom = jnp.sum(e, axis=-1, keepdims=True)                          # (N, 1)

    # Un-normalized PV matmul, then one exact divide per output row (O(N*dh)).
    o = jnp.dot(e.astype(cdt), v.astype(cdt),
                preferred_element_type=jnp.float32)                     # (N, dh)
    o = o / denom

    acc_ref[...] += jnp.dot(o.astype(cdt), wp_ref[...],
                            preferred_element_type=jnp.float32)         # (N, C)

    @pl.when(h == pl.num_programs(1) - 1)
    def _():
        y = acc_ref[...] + bp_ref[...]                                   # (N, C)
        y_ref[...] = y
        n_rows = y.shape[0]
        tile_sum = jnp.sum(y, axis=0, keepdims=True)                     # (1, C)
        d = y - tile_sum / n_rows
        tile_m2 = jnp.sum(d * d, axis=0, keepdims=True)                  # (1, C)
        stats_ref[...] = jnp.concatenate([tile_sum, tile_m2], axis=0)    # (2, C)


def _bn_apply_kernel(y_ref, stats_ref, gamma_ref, beta_ref, o_ref, *, eps):
    """Combine per-tile stats (Chan's formula) and apply training-mode BN1d."""
    n_rows = y_ref.shape[0]
    s = stats_ref[...]                                # (num_tiles, 2, C), tiny & resident
    count = s.shape[0] * n_rows

    tile_sum = s[:, 0:1, :]                           # (T, 1, C)
    tile_m2 = s[:, 1:2, :]                            # (T, 1, C)
    mean = jnp.sum(tile_sum, axis=0) / count          # (1, C)
    delta = tile_sum / n_rows - mean                  # (T, 1, C)
    var = (jnp.sum(tile_m2, axis=0)
           + n_rows * jnp.sum(delta * delta, axis=0)) / count            # biased var

    scale = gamma_ref[...] * lax.rsqrt(var + eps)     # (1, C)
    shift = beta_ref[...] - mean * scale
    o_ref[...] = y_ref[...] * scale + shift


def _vmem_limit_bytes():
    """Generation-aware scoped-VMEM limit (v5e/v6e: 128 MiB phys, v7x: 64 MiB)."""
    try:
        cap = pltpu.get_tpu_info().vmem_capacity_bytes
    except Exception:   # info unavailable (e.g. interpret mode off-device)
        return 32 * 1024 * 1024
    return max(32 * 1024 * 1024, min(int(cap * 0.7), 100 * 1024 * 1024))


def attention_forward(x, w_qkv, w_proj, b_proj, gamma, beta, *,
                      heads, dim_head, eps=1e-5, compute_dtype=jnp.float32):
    B, N, C = x.shape
    inner = heads * dim_head
    scale = dim_head ** (-0.5)

    # ---- one-off weight prep in the wrapper (HBM layout plumbing) ----
    # w_qkv columns are ordered (qkv, head, dim_head); split into per-head blocks
    # so the kernel never slices the lane axis at sub-128 offsets.
    w_r = w_qkv.reshape(C, 3, heads, dim_head)
    wq = (jnp.transpose(w_r[:, 0], (1, 0, 2)) * scale).astype(compute_dtype)  # (H, C, dh)
    wk = jnp.transpose(w_r[:, 1], (1, 0, 2)).astype(compute_dtype)            # (H, C, dh)
    wv = jnp.transpose(w_r[:, 2], (1, 0, 2)).astype(compute_dtype)            # (H, C, dh)
    wp = w_proj.reshape(heads, dim_head, C).astype(compute_dtype)             # (H, dh, C)
    xc = x.astype(compute_dtype)
    bp = b_proj.reshape(1, C).astype(jnp.float32)
    g = gamma.reshape(1, C).astype(jnp.float32)
    bt = beta.reshape(1, C).astype(jnp.float32)

    vmem_limit = _vmem_limit_bytes()
    itemsize = jnp.dtype(compute_dtype).itemsize

    attn_cost = pl.CostEstimate(
        flops=(2 * B * N * C * 3 * inner            # QKV projections
               + 4 * B * heads * N * N * dim_head   # QK^T and PV
               + 2 * B * N * inner * C),            # output projection
        transcendentals=B * heads * N * N,
        bytes_accessed=(xc.size + wq.size + wk.size + wv.size + wp.size) * itemsize
                       + (B * N * C + B * 2 * C + C) * 4,
    )

    # ---- kernel A: attention + projection, per-(batch, head) grid ----
    # x block changes once per batch element; weight blocks are tiny per-head
    # tiles.  (On v5e one could add pipeline_mode=pl.Buffered(3) for deeper
    # prefetch of the x row tile.)
    y, stats = pl.pallas_call(
        _attn_proj_kernel,
        grid_spec=pltpu.PrefetchScalarGridSpec(
            num_scalar_prefetch=0,
            grid=(B, heads),                                   # reduction axis last
            in_specs=[
                pl.BlockSpec((None, N, C), lambda b, h: (b, 0, 0)),         # x row tile
                pl.BlockSpec((None, C, dim_head), lambda b, h: (h, 0, 0)),  # wq
                pl.BlockSpec((None, C, dim_head), lambda b, h: (h, 0, 0)),  # wk
                pl.BlockSpec((None, C, dim_head), lambda b, h: (h, 0, 0)),  # wv
                pl.BlockSpec((None, dim_head, C), lambda b, h: (h, 0, 0)),  # wp
                pl.BlockSpec((1, C), lambda b, h: (0, 0)),                  # proj bias
            ],
            out_specs=[
                pl.BlockSpec((None, N, C), lambda b, h: (b, 0, 0)),         # y (pre-BN)
                pl.BlockSpec((None, 2, C), lambda b, h: (b, 0, 0)),         # tile stats
            ],
            scratch_shapes=[pltpu.VMEM((N, C), jnp.float32)],               # projection acc
        ),
        out_shape=[
            jax.ShapeDtypeStruct((B, N, C), jnp.float32),
            jax.ShapeDtypeStruct((B, 2, C), jnp.float32),
        ],
        compiler_params=pltpu.CompilerParams(
            dimension_semantics=("parallel", "arbitrary"),
            vmem_limit_bytes=vmem_limit),
        cost_estimate=attn_cost,
    )(xc, wq, wk, wv, wp, bp)

    bn_cost = pl.CostEstimate(
        flops=3 * B * N * C,
        transcendentals=B * C,
        bytes_accessed=(2 * B * N * C + B * 2 * C + 2 * C) * 4,
    )

    # ---- kernel B: streaming BatchNorm apply (stats combined in-kernel) ----
    out = pl.pallas_call(
        functools.partial(_bn_apply_kernel, eps=eps),
        grid_spec=pltpu.PrefetchScalarGridSpec(
            num_scalar_prefetch=0,
            grid=(B,),
            in_specs=[
                pl.BlockSpec((None, N, C), lambda b: (b, 0, 0)),   # y row tile
                pl.BlockSpec((B, 2, C), lambda b: (0, 0, 0)),      # all tile stats (tiny)
                pl.BlockSpec((1, C), lambda b: (0, 0)),            # gamma
                pl.BlockSpec((1, C), lambda b: (0, 0)),            # beta
            ],
            out_specs=pl.BlockSpec((None, N, C), lambda b: (b, 0, 0)),
        ),
        out_shape=jax.ShapeDtypeStruct((B, N, C), jnp.float32),
        compiler_params=pltpu.CompilerParams(
            dimension_semantics=("parallel",),
            vmem_limit_bytes=vmem_limit),
        cost_estimate=bn_cost,
    )(y, stats, g, bt)

    return out


def reference(x, w_qkv, w_proj, b_proj, gamma, beta, *, heads, dim_head, eps=1e-5):
    # Pure-JAX mirror of the PyTorch forward (training-mode batch norm).
    B, N, C = x.shape
    inner = heads * dim_head
    scale = dim_head ** (-0.5)
    qkv = x @ w_qkv
    qkv = qkv.reshape(B, N, 3, heads, dim_head).transpose(2, 0, 3, 1, 4)
    q, k, v = qkv[0] * scale, qkv[1], qkv[2]
    attn = jax.nn.softmax(jnp.einsum('bhqd,bhkd->bhqk', q, k), axis=-1)
    out = jnp.einsum('bhqk,bhkd->bhqd', attn, v)
    out = out.transpose(0, 2, 1, 3).reshape(B, N, inner)
    out = out @ w_proj + b_proj.reshape(1, C)
    mean = out.mean(axis=(0, 1), keepdims=True)
    var = ((out - mean) ** 2).mean(axis=(0, 1), keepdims=True)
    return ((out - mean) / jnp.sqrt(var + eps) * gamma.reshape(1, 1, C)
            + beta.reshape(1, 1, C))


if __name__ == "__main__":
    B, N, dim = 2, 8, 32
    heads, dim_head = 2, 16
    inner = heads * dim_head

    key = jax.random.PRNGKey(0)
    kx, k1, k2, k3 = jax.random.split(key, 4)
    x = jax.random.normal(kx, (B, N, dim), jnp.float32)
    # Synthetic parameters (PyTorch Linear weights are (out, in); stored here
    # pre-transposed as (in, out)).
    w_qkv = jax.random.normal(k1, (dim, 3 * inner), jnp.float32) * 0.05
    w_proj = jax.random.normal(k2, (inner, dim), jnp.float32) * 0.05
    b_proj = jax.random.normal(k3, (1, dim), jnp.float32) * 0.05
    gamma = jnp.ones((1, dim), jnp.float32)   # BatchNorm1d default weight
    beta = jnp.zeros((1, dim), jnp.float32)   # BatchNorm1d default bias

    out = attention_forward(x, w_qkv, w_proj, b_proj, gamma, beta,
                            heads=heads, dim_head=dim_head)
    out = jax.block_until_ready(out)

    ref = reference(x, w_qkv, w_proj, b_proj, gamma, beta,
                    heads=heads, dim_head=dim_head)
    assert out.shape == (B, N, dim)
    # All MXU/softmax/BN math runs in exact f32 on this path, so differences vs.
    # the f32 reference are only summation-order rounding (well under 5e-3 even
    # after BatchNorm's 1/std amplification).
    assert jnp.allclose(out, ref, atol=5e-3, rtol=5e-3), "mismatch vs reference"
    print("KERNEL_OK")
</pallas_src>

<mosaic_0001>
module attributes {stable_mosaic.version = 11 : i64} {
  func.func @_attn_proj_kernel(%arg0: i32, %arg1: i32, %arg2: memref<1x8x32xf32, #tpu.memory_space<vmem>>, %arg3: memref<1x32x16xf32, #tpu.memory_space<vmem>>, %arg4: memref<1x32x16xf32, #tpu.memory_space<vmem>>, %arg5: memref<1x32x16xf32, #tpu.memory_space<vmem>>, %arg6: memref<1x16x32xf32, #tpu.memory_space<vmem>>, %arg7: memref<1x32xf32, #tpu.memory_space<vmem>>, %arg8: memref<1x8x32xf32, #tpu.memory_space<vmem>>, %arg9: memref<1x2x32xf32, #tpu.memory_space<vmem>>, %arg10: memref<8x32xf32, #tpu.memory_space<vmem>>) attributes {dimension_semantics = [#tpu.dimension_semantics<parallel>, #tpu.dimension_semantics<arbitrary>], iteration_bounds = array<i64: 2, 2>, scalar_prefetch = 0 : i64, scratch_operands = 1 : i64, tpu.core_type = #tpu.core_type<tc>, window_params = [{transform_indices = @transform_0, window_bounds = array<i64: 1, 8, 32>}, {transform_indices = @transform_1, window_bounds = array<i64: 1, 32, 16>}, {transform_indices = @transform_2, window_bounds = array<i64: 1, 32, 16>}, {transform_indices = @transform_3, window_bounds = array<i64: 1, 32, 16>}, {transform_indices = @transform_4, window_bounds = array<i64: 1, 16, 32>}, {pipeline_mode = #tpu.pipeline_mode<synchronous>, transform_indices = @transform_5, window_bounds = array<i64: 1, 32>}, {transform_indices = @transform_6, window_bounds = array<i64: 1, 8, 32>}, {transform_indices = @transform_7, window_bounds = array<i64: 1, 2, 32>}]} {
    %c0_i32 = arith.constant 0 : i32
    %0 = arith.cmpi eq, %arg1, %c0_i32 : i32
    %1 = arith.extui %0 : i1 to i32
    %c0_i32_0 = arith.constant 0 : i32
    %2 = arith.cmpi ne, %1, %c0_i32_0 : i32
    scf.if %2 {
      %cst_27 = arith.constant 0.000000e+00 : f32
      %34 = vector.broadcast %cst_27 : f32 to vector<8x32xf32>
      %c0_28 = arith.constant 0 : index
      %c0_29 = arith.constant 0 : index
      %35 = vector.load %arg10[%c0_28, %c0_29] : memref<8x32xf32, #tpu.memory_space<vmem>>, vector<8x32xf32>
      tpu.vector_store %arg10[%c0_28, %c0_29], %34 {strides = array<i32>} : memref<8x32xf32, #tpu.memory_space<vmem>>, vector<8x32xf32>,
    } else {
    }
    %c0 = arith.constant 0 : index
    %c0_1 = arith.constant 0 : index
    %c0_2 = arith.constant 0 : index
    %3 = vector.load %arg2[%c0, %c0_1, %c0_2] : memref<1x8x32xf32, #tpu.memory_space<vmem>>, vector<1x8x32xf32>
    %4 = vector.shape_cast %3 : vector<1x8x32xf32> to vector<8x32xf32>
    %c0_3 = arith.constant 0 : index
    %c0_4 = arith.constant 0 : index
    %c0_5 = arith.constant 0 : index
    %5 = vector.load %arg3[%c0_3, %c0_4, %c0_5] : memref<1x32x16xf32, #tpu.memory_space<vmem>>, vector<1x32x16xf32>
    %6 = vector.shape_cast %5 : vector<1x32x16xf32> to vector<32x16xf32>
    %cst = arith.constant dense<0.000000e+00> : vector<8x16xf32>
    %7 = tpu.matmul %4, %6, %cst {dimension_numbers = #tpu.dot_dimension_numbers<[1], [0], [0], [1], [0, 0, 1, 1], [], []>} : vector<8x32xf32>, vector<32x16xf32>, vector<8x16xf32> -> vector<8x16xf32>
    %c0_6 = arith.constant 0 : index
    %c0_7 = arith.constant 0 : index
    %c0_8 = arith.constant 0 : index
    %8 = vector.load %arg4[%c0_6, %c0_7, %c0_8] : memref<1x32x16xf32, #tpu.memory_space<vmem>>, vector<1x32x16xf32>
    %9 = vector.shape_cast %8 : vector<1x32x16xf32> to vector<32x16xf32>
    %cst_9 = arith.constant dense<0.000000e+00> : vector<8x16xf32>
    %10 = tpu.matmul %4, %9, %cst_9 {dimension_numbers = #tpu.dot_dimension_numbers<[1], [0], [0], [1], [0, 0, 1, 1], [], []>} : vector<8x32xf32>, vector<32x16xf32>, vector<8x16xf32> -> vector<8x16xf32>
    %c0_10 = arith.constant 0 : index
    %c0_11 = arith.constant 0 : index
    %c0_12 = arith.constant 0 : index
    %11 = vector.load %arg5[%c0_10, %c0_11, %c0_12] : memref<1x32x16xf32, #tpu.memory_space<vmem>>, vector<1x32x16xf32>
    %12 = vector.shape_cast %11 : vector<1x32x16xf32> to vector<32x16xf32>
    %cst_13 = arith.constant dense<0.000000e+00> : vector<8x16xf32>
    %13 = tpu.matmul %4, %12, %cst_13 {dimension_numbers = #tpu.dot_dimension_numbers<[1], [0], [0], [1], [0, 0, 1, 1], [], []>} : vector<8x32xf32>, vector<32x16xf32>, vector<8x16xf32> -> vector<8x16xf32>
    %cst_14 = arith.constant dense<0.000000e+00> : vector<8x8xf32>
    %14 = tpu.matmul %7, %10, %cst_14 {dimension_numbers = #tpu.dot_dimension_numbers<[1], [1], [0], [0], [0, 0, 1, 0], [], []>} : vector<8x16xf32>, vector<8x16xf32>, vector<8x8xf32> -> vector<8x8xf32>
    %cst_15 = arith.constant dense<0xFF800000> : vector<8xf32>
    %15 = vector.multi_reduction <maximumf>, %14, %cst_15 [1] : vector<8x8xf32> to vector<8xf32>
    %16 = vector.shape_cast %15 : vector<8xf32> to vector<8x1xf32>
    %17 = vector.broadcast %16 : vector<8x1xf32> to vector<8x8xf32>
    %18 = arith.subf %14, %17 : vector<8x8xf32>
    %19 = math.exp %18 : vector<8x8xf32>
    %cst_16 = arith.constant dense<0.000000e+00> : vector<8xf32>
    %20 = vector.multi_reduction <add>, %19, %cst_16 [1] : vector<8x8xf32> to vector<8xf32>
    %21 = vector.shape_cast %20 : vector<8xf32> to vector<8x1xf32>
    %cst_17 = arith.constant dense<0.000000e+00> : vector<8x16xf32>
    %22 = tpu.matmul %19, %13, %cst_17 {dimension_numbers = #tpu.dot_dimension_numbers<[1], [0], [0], [1], [0, 0, 1, 1], [], []>} : vector<8x8xf32>, vector<8x16xf32>, vector<8x16xf32> -> vector<8x16xf32>
    %23 = vector.broadcast %21 : vector<8x1xf32> to vector<8x16xf32>
    %24 = arith.divf %22, %23 : vector<8x16xf32>
    %c0_18 = arith.constant 0 : index
    %c0_19 = arith.constant 0 : index
    %25 = vector.load %arg10[%c0_18, %c0_19] : memref<8x32xf32, #tpu.memory_space<vmem>>, vector<8x32xf32>
    %c0_20 = arith.constant 0 : index
    %c0_21 = arith.constant 0 : index
    %c0_22 = arith.constant 0 : index
    %26 = vector.load %arg6[%c0_20, %c0_21, %c0_22] : memref<1x16x32xf32, #tpu.memory_space<vmem>>, vector<1x16x32xf32>
    %27 = vector.shape_cast %26 : vector<1x16x32xf32> to vector<16x32xf32>
    %cst_23 = arith.constant dense<0.000000e+00> : vector<8x32xf32>
    %28 = tpu.matmul %24, %27, %cst_23 {dimension_numbers = #tpu.dot_dimension_numbers<[1], [0], [0], [1], [0, 0, 1, 1], [], []>} : vector<8x16xf32>, vector<16x32xf32>, vector<8x32xf32> -> vector<8x32xf32>
    %29 = arith.addf %25, %28 : vector<8x32xf32>
    %c0_24 = arith.constant 0 : index
    %c0_25 = arith.constant 0 : index
    %30 = vector.load %arg10[%c0_24, %c0_25] : memref<8x32xf32, #tpu.memory_space<vmem>>, vector<8x32xf32>
    tpu.vector_store %arg10[%c0_24, %c0_25], %29 {strides = array<i32>} : memref<8x32xf32, #tpu.memory_space<vmem>>, vector<8x32xf32>,
    %c1_i32 = arith.constant 1 : i32
    %31 = arith.cmpi eq, %arg1, %c1_i32 : i32
    %32 = arith.extui %31 : i1 to i32
    %c0_i32_26 = arith.constant 0 : i32
    %33 = arith.cmpi ne, %32, %c0_i32_26 : i32
    scf.if %33 {
      %c0_27 = arith.constant 0 : index
      %c0_28 = arith.constant 0 : index
      %34 = vector.load %arg10[%c0_27, %c0_28] : memref<8x32xf32, #tpu.memory_space<vmem>>, vector<8x32xf32>
      %c0_29 = arith.constant 0 : index
      %c0_30 = arith.constant 0 : index
      %35 = vector.load %arg7[%c0_29, %c0_30] : memref<1x32xf32, #tpu.memory_space<vmem>>, vector<1x32xf32>
      %36 = vector.broadcast %35 : vector<1x32xf32> to vector<8x32xf32>
      %37 = arith.addf %34, %36 : vector<8x32xf32>
      %c0_31 = arith.constant 0 : index
      %c0_32 = arith.constant 0 : index
      %c0_33 = arith.constant 0 : index
      %38 = vector.load %arg8[%c0_31, %c0_32, %c0_33] : memref<1x8x32xf32, #tpu.memory_space<vmem>>, vector<1x8x32xf32>
      %39 = vector.shape_cast %38 : vector<1x8x32xf32> to vector<8x32xf32>
      %40 = vector.shape_cast %37 : vector<8x32xf32> to vector<1x8x32xf32>
      tpu.vector_store %arg8[%c0_31, %c0_32, %c0_33], %40 {strides = array<i32>} : memref<1x8x32xf32, #tpu.memory_space<vmem>>, vector<1x8x32xf32>,
      %cst_34 = arith.constant dense<0.000000e+00> : vector<32xf32>
      %41 = vector.multi_reduction <add>, %37, %cst_34 [0] : vector<8x32xf32> to vector<32xf32>
      %42 = vector.shape_cast %41 : vector<32xf32> to vector<1x32xf32>
      %cst_35 = arith.constant 8.000000e+00 : f32
      %43 = vector.broadcast %cst_35 : f32 to vector<1x32xf32>
      %44 = arith.divf %42, %43 : vector<1x32xf32>
      %45 = vector.broadcast %44 : vector<1x32xf32> to vector<8x32xf32>
      %46 = arith.subf %37, %45 : vector<8x32xf32>
      %47 = arith.mulf %46, %46 : vector<8x32xf32>
      %cst_36 = arith.constant dense<0.000000e+00> : vector<32xf32>
      %48 = vector.multi_reduction <add>, %47, %cst_36 [0] : vector<8x32xf32> to vector<32xf32>
      %49 = vector.shape_cast %48 : vector<32xf32> to vector<1x32xf32>
      %50 = tpu.concatenate %42, %49 in 0 : vector<1x32xf32>, vector<1x32xf32> -> vector<2x32xf32>
      %c0_37 = arith.constant 0 : index
      %c0_38 = arith.constant 0 : index
      %c0_39 = arith.constant 0 : index
      %51 = vector.load %arg9[%c0_37, %c0_38, %c0_39] : memref<1x2x32xf32, #tpu.memory_space<vmem>>, vector<1x2x32xf32>
      %52 = vector.shape_cast %51 : vector<1x2x32xf32> to vector<2x32xf32>
      %53 = vector.shape_cast %50 : vector<2x32xf32> to vector<1x2x32xf32>
      tpu.vector_store %arg9[%c0_37, %c0_38, %c0_39], %53 {strides = array<i32>} : memref<1x2x32xf32, #tpu.memory_space<vmem>>, vector<1x2x32xf32>,
    } else {
    }
    return
  }
  func.func @transform_0(%arg0: i32, %arg1: i32) -> (i32, i32, i32) {
    %c0_i32 = arith.constant 0 : i32
    %c0_i32_0 = arith.constant 0 : i32
    %c0_i32_1 = arith.constant 0 : i32
    return %arg0, %c0_i32, %c0_i32_0 : i32, i32, i32
  }
  func.func @transform_1(%arg0: i32, %arg1: i32) -> (i32, i32, i32) {
    %c0_i32 = arith.constant 0 : i32
    %c0_i32_0 = arith.constant 0 : i32
    %c0_i32_1 = arith.constant 0 : i32
    return %arg1, %c0_i32, %c0_i32_0 : i32, i32, i32
  }
  func.func @transform_2(%arg0: i32, %arg1: i32) -> (i32, i32, i32) {
    %c0_i32 = arith.constant 0 : i32
    %c0_i32_0 = arith.constant 0 : i32
    %c0_i32_1 = arith.constant 0 : i32
    return %arg1, %c0_i32, %c0_i32_0 : i32, i32, i32
  }
  func.func @transform_3(%arg0: i32, %arg1: i32) -> (i32, i32, i32) {
    %c0_i32 = arith.constant 0 : i32
    %c0_i32_0 = arith.constant 0 : i32
    %c0_i32_1 = arith.constant 0 : i32
    return %arg1, %c0_i32, %c0_i32_0 : i32, i32, i32
  }
  func.func @transform_4(%arg0: i32, %arg1: i32) -> (i32, i32, i32) {
    %c0_i32 = arith.constant 0 : i32
    %c0_i32_0 = arith.constant 0 : i32
    %c0_i32_1 = arith.constant 0 : i32
    return %arg1, %c0_i32, %c0_i32_0 : i32, i32, i32
  }
  func.func @transform_5(%arg0: i32, %arg1: i32) -> (i32, i32) {
    %c0_i32 = arith.constant 0 : i32
    %c0_i32_0 = arith.constant 0 : i32
    %c0_i32_1 = arith.constant 0 : i32
    return %c0_i32, %c0_i32_0 : i32, i32
  }
  func.func @transform_6(%arg0: i32, %arg1: i32) -> (i32, i32, i32) {
    %c0_i32 = arith.constant 0 : i32
    %c0_i32_0 = arith.constant 0 : i32
    %c0_i32_1 = arith.constant 0 : i32
    return %arg0, %c0_i32, %c0_i32_0 : i32, i32, i32
  }
  func.func @transform_7(%arg0: i32, %arg1: i32) -> (i32, i32, i32) {
    %c0_i32 = arith.constant 0 : i32
    %c0_i32_0 = arith.constant 0 : i32
    %c0_i32_1 = arith.constant 0 : i32
    return %arg0, %c0_i32, %c0_i32_0 : i32, i32, i32
  }
}

</mosaic_0001>

<bundles_post_ra>
// kernel: tpu_custom_call.1
= control target key start
LH: loop header
LB: loop body
LE: loop exit
PB: predicated region body
PF: predicated region fallthrough
CT: control target
= control target key end

     0   :  { %s1262_s0 = inlined_call_operand.vmem [shape: f32[2,8,32], index: 0, kind: input, shape index: {}]   ;;  %s1263_s1 = inlined_call_operand.vmem [shape: f32[2,32,16], index: 1, kind: input, shape index: {}]   ;;  %s1264_s2 = inlined_call_operand.vmem [shape: f32[2,32,16], index: 2, kind: input, shape index: {}]   ;;  %s1265_s3 = inlined_call_operand.vmem [shape: f32[2,32,16], index: 3, kind: input, shape index: {}]   ;;  %s1266_s4 = inlined_call_operand.vmem [shape: f32[2,16,32], index: 4, kind: input, shape index: {}]   ;;  %s1267_s5 = inlined_call_operand.vmem [shape: f32[1,32], index: 5, kind: input, shape index: {}]   ;;  %s1268_s6 = inlined_call_operand.hbm [shape: f32[2,8,32], index: 6, kind: output, shape index: {0}]   ;;  %s1269_s7 = inlined_call_operand.hbm [shape: f32[2,2,32], index: 7, kind: output, shape index: {1}]  }
   0x1   :  { %1280 = sst [smem:[#allocation19_spill]] %s1269_s7 }
   0x2   :  { %13 = vsyncpa [#allocation4], 0 }
   0x3   :  { %15 = vsyncpa [#allocation4 + $0x1], 0 }
   0x4   :  { %16 = vsyncpa [#allocation6], 0 }
   0x5   :  { %18 = vsyncpa [#allocation6 + $0x1], 0  ;;  %s1078_s24 = smov 0   ;;  %s1080_s25 = smov 0  }
   0x6   :  { %s1082_s26 = smov 0   ;;  %s1084_s27 = smov 0  }
   0x7   :  { %s1086_s28 = smov 0   ;;  %s1088_s29 = smov 0  }
   0x8   :  { %s1090_s30 = smov 0   ;;  %s1092_s8 = smov 0  }
   0x9 LB: > { %1281 = sst [smem:[#allocation9_spill]] %s1006_s24  ;;  %s788_s9 = sadd.s32 4294967295, %s1034_s8   ;;  %s1034_s8 = sphi %s1092_s8, %s24_s8   ;;  %s1030_s30 = sphi %s1090_s30, %s1303_s30   ;;  %s1026_s29 = sphi %s1088_s29, %s1302_s29   ;;  %s1022_s28 = sphi %s1086_s28, %s1301_s28   ;;  %s1018_s27 = sphi %s1084_s27, %s1300_s27   ;;  %s1014_s26 = sphi %s1082_s26, %s1299_s26   ;;  %s1010_s25 = sphi %s1080_s25, %s1298_s25   ;;  %s1006_s24 = sphi %s1078_s24, %s1297_s24  }
   0xa   : > { %1282 = sst [smem:[#allocation10_spill]] %s1010_s25  ;;  %s789_s10 = sadd.s32 4294967294, %s1034_s8  }
   0xb   : > { %1283 = sst [smem:[#allocation11_spill]] %s1014_s26  ;;  %s33_s11 = sadd.s32 1, %s1026_s29 }
   0xc   : > { %1284 = sst [smem:[#allocation12_spill]] %s1026_s29  ;;  %p34_p0 = scmp.ge.s32.totalorder %s33_s11, 2 }
   0xd   : > { %1285 = sst [smem:[#allocation13_spill]] %s1030_s30  ;;  %s36_s12 = sadd.s32 1, %s1030_s30 }
   0xe   : > { %1286 = sst [smem:[#allocation14_spill]] %s1034_s8  ;;  %p204_p1 = scmp.ne.s32.totalorder %s1014_s26, %s1010_s25 }
   0xf   : > { %p205_p2 = scmp.eq.s32.totalorder %s788_s9, 3  ;;  %s1305_s11 = smov (%p34_p0, %s33_s11), 0 }
  0x10   : > { %1287 = sst [smem:[#allocation15_spill]] %s1305_s11  ;;  %s1307_s12 = smov (!%p34_p0, %s36_s12), %s1030_s30 }
  0x11   : > { %p1127_p3 = por %p205_p2, %p204_p1  ;;  %p210_p4 = scmp.ne.s32.totalorder %s1010_s25, %s1006_s24 }
  0x12   : > { %p38_p5 = scmp.ge.s32.totalorder %s1307_s12, 2  ;;  %p211_p6 = scmp.eq.s32.totalorder %s789_s10, 3 }
  0x13   : > { %p792_p7 = scmp.ge.s32.totalorder %s1034_s8, 1  ;;  %p297_p8 = scmp.lt.s32.totalorder %s1034_s8, 5 }
  0x14   : > { %s1309_s12 = smov (%p38_p5, %s1307_s12), 0  ;;  %p1137_p9 = por %p211_p6, %p210_p4 }
  0x15   : > { %1289 = sst [smem:[#allocation16_spill]] %s1309_s12  ;;  %p298_p10 = pnand %p792_p7, %p297_p8 }
  0x16   : > { %s1290_s14 = scalar_select %p1137_p9, 1, 0 }
  0x17   : > { %s191_s15 = ssub.s32 %s1030_s30, %s1309_s12  ;;  %s194_s16 = sadd.s32 1, %s1014_s26 }
  0x18   : > { %1291 = sst [smem:[#allocation17_spill]] %s1290_s14  ;;  %p192_p11 = scmp.eq.s32.totalorder %s191_s15, 0 }
  0x19   : > { %301 = sbr.rel (%p298_p10) target bundleno = 786 (0x312), region = 44  ;;  %s1148_s18 = sand.u32 (!%p298_p10), 1, %s1010_s25  }
  0x1a   : > { %s1145_s17 = scalar_select %p192_p11, %s1014_s26, %s194_s16  }
  0x1b   : > { %p353_p12 = scmp.lt.s32.totalorder (!%p298_p10), %s1022_s28, 1  ;;  %s793_s19 = sshll.u32 (!%p298_p10), %s1148_s18, 3 }
  0x1c   : > { %1292 = sst [smem:[#allocation18_spill]] %s1145_s17  ;;  %s794_s20 = sshll.u32 (!%p298_p10), %s1148_s18, 1 }
  0x1d   : > { %p357_p13 = scmp.lt.s32.totalorder (!%p298_p10), %s1018_s27, 1  ;;  %s1175_s23 = scalar_lea.vmem (!%p298_p10), [#allocation3], %s793_s19 }
  0x1e   : > { %s354_s21 = scalar_select %p353_p12, %s1022_s28, 1 }
  0x1f   : > { %s358_s15 = scalar_select %p357_p13, %s1018_s27, 1 }
  0x20   : > { %s795_s22 = sshll.u32 %s354_s21, 3  ;;  %s1177_s9 = scalar_lea.vmem [#allocation5], %s794_s20 }
  0x21   : > { %s356_s10 = scalar_lea.vmem %s1262_s0, %s795_s22  ;;  %s819_s16 = sshll.u32 %s358_s15, 5 }
  0x22   : > { %s822_s12 = sshll.u32 %s358_s15, 4  ;;  %s361_s29 = scalar_lea.vmem %s1263_s1, %s819_s16 }
  0x23   : > { %s366_s25 = scalar_lea.vmem %s1264_s2, %s819_s16  ;;  %s1168_s8 = scalar_lea.vmem %s1265_s3, %s819_s16 }
  0x24   : > { %s1173_s22 = scalar_lea.vmem %s1266_s4, %s822_s12  ;;  %p804_p0 = scmp.ne.s32.totalorder %s1018_s27, 0 }
  0x26   : > { %380 = sbr.rel (%p804_p0) target bundleno = 45 (0x2d), region = 48 }
  0x2b   : > { %vm381_vm0 = vcmask 261120   ;;  %v1036_v0 = vmov 0.0  }
  0x2c   : > { %382 = vst.msk [vmem:[#allocation2] sm:$0xff] %vm381_vm0, %v1036_v0 }
  0x2d PF: > { %v415_v1 = vld [vmem:[%s366_s25 + $0x18] sm:$0xff]  ;;  %v414_v2 = vld [vmem:[%s366_s25 + $0x10] sm:$0xff]  ;;  %v413_v5 = vld [vmem:[%s366_s25 + $0x8] sm:$0xff]  ;;  %vm388_vm1 = vcmask 261120   ;;  %vm460_vm2 = vcmask 130048   ;;  %vm487_vm3 = vcmask 64512  }
  0x2e   : > { %v387_v3 = vld [vmem:[%s361_s29 + $0x18] sm:$0xff]  ;;  %428 = vmatpush.msra.mxu1 %v415_v1  ;;  %v386_v4 = vld [vmem:[%s361_s29 + $0x10] sm:$0xff]  ;;  %v385_v6 = vld [vmem:[%s361_s29 + $0x8] sm:$0xff]  ;;  %p812_p1 = scmp.ne.s32.totalorder %s1018_s27, 1 }
  0x2f   : > { %404 = vmatpush.msra.mxu0 %v387_v3  ;;  %v412_v7 = vld [vmem:[%s366_s25] sm:$0xff]  ;;  %v439_v10 = vld [vmem:[%s1168_s8 + $0x18] sm:$0xff]  ;;  %v438_v11 = vld [vmem:[%s1168_s8 + $0x10] sm:$0xff] }
  0x30   : > { %429 = vmatpush.msra.mxu1 %v414_v2  ;;  %v384_v8 = vld [vmem:[%s361_s29] sm:$0xff]  ;;  %452 = vmatpush.msra.mxu2 %v439_v10  ;;  %v437_v12 = vld [vmem:[%s1168_s8 + $0x8] sm:$0xff] }
  0x31   : > { %405 = vmatpush.msra.mxu0 %v386_v4  ;;  %v383_v9 = vld [vmem:[%s356_s10] sm:$0xff]  ;;  %v537_v24 = vld [vmem:[%s1173_s22 + $0x8] sm:$0xff] }
  0x32   : > { %430 = vmatpush.msra.mxu1 %v413_v5  ;;  %453 = vmatpush.msra.mxu2 %v438_v11  ;;  %v436_v13 = vld [vmem:[%s1168_s8] sm:$0xff] }
  0x33   : > { %406 = vmatpush.msra.mxu0 %v385_v6  ;;  %v536_v25 = vld [vmem:[%s1173_s22] sm:$0xff] }
  0x34   : > { %431 = vmatpush.msra.mxu1 %v412_v7  ;;  %454 = vmatpush.msra.mxu2 %v437_v12  ;;  %v535_v39 = vld [vmem:[#allocation2] sm:$0xff] }
  0x35   : > { %407 = vmatpush.msra.mxu0 %v384_v8  ;;  %806 = vmatmul.msk.f32.vlgmr.msra.gmra.mxu1 %vm388_vm1, %v383_v9 }
  0x36   : > { %805 = vmatmul.msk.f32.vlgmr.msra.gmra.mxu0 %vm388_vm1, %v383_v9  ;;  %455 = vmatpush.msra.mxu2 %v436_v13 }
  0x37   : > { %807 = vmatmul.msk.f32.vlgmr.msra.gmra.mxu2 %vm388_vm1, %v383_v9  ;;  %555 = vmatpush.msrb.mxu0 %v537_v24 }
  0x39   : > { %556 = vmatpush.msrb.mxu0 %v536_v25 }
  0xb2   : > { %v433_v14 = vpop.f32.mrf.mxu1 }
  0xb3   : > { %808 = vmatpush.xpose.msk.msra.mxu3 %vm460_vm2, %v433_v14  ;;  %v409_v15 = vpop.f32.mrf.mxu0 }
  0xb6   : > { %809 = vmatmul.msk.f32.vlgmr.msra.gmra.mxu3 %vm460_vm2, %v409_v15 }
  0xba   : > { %v457_v18 = vpop.f32.mrf.mxu2 }
  0xbb   : > { %515 = vmatpush.msrb.mxu3 %v457_v18 }
 0x139   : > { %v484_v16 = vpop.f32.mrf.mxu3 }
 0x13a   : > { %v488_v17 = vsel %vm487_vm3, %v484_v16, -inf }
 0x13b   : > { %489 = vmax.xlane.f32.xlu0 %v488_v17 }
 0x1ae   : > { %v490_v19 = vpop.xlane.xlu0 %489 }
 0x1af   : > { %v491_v20 = vsub.f32 %v484_v16, %v490_v19 }
 0x1b1   : > { %v492_v21 = vmul.f32 1.442695, %v491_v20 }
 0x1b3   : > { %901 = vpow2.f32 %v492_v21 }
 0x1b9   : > { %v902_v22 = vpop.eup %901 }
 0x1ba   : > { %810 = vmatmul.msk.f32.vlgmr.msrb.gmra.mxu3 %vm487_vm3, %v902_v22  ;;  %v494_v23 = vsel %vm487_vm3, %v902_v22, 0.0 }
 0x1bb   : > { %495 = vadd.xlane.f32.xlu0 %v494_v23 }
 0x22e   : > { %v496_v26 = vpop.xlane.xlu0 %495 }
 0x22f   : > { %903 = vrcp.f32 %v496_v26  ;;  %v531_v30 = vand.u32 2147483648, %v496_v26  ;;  %v529_v32 = vand.u32 2147483647, %v496_v26  ;;  %vm525_vm5 = vweird.f32 %v496_v26 }
 0x231   : > { %v532_v34 = vor.u32 1.1754944e-38, %v531_v30  ;;  %vm530_vm7 = vcmp.eq.f32.partialorder %v529_v32, 8.507059e+37 }
 0x235   : > { %v904_v27 = vpop.eup %903 }
 0x236   : > { %v521_v28 = vmul.f32 %v904_v27, %v496_v26  ;;  %vm526_vm4 = vweird.f32 %v904_v27 }
 0x237   : > { %vm527_vm6 = vmor %vm525_vm5, %vm526_vm4 }
 0x238   : > { %v522_v29 = vsub.f32 1.0, %v521_v28 }
 0x23a   : > { %v523_v31 = vmul.f32 %v904_v27, %v522_v29 }
 0x23c   : > { %v524_v33 = vadd.f32 %v904_v27, %v523_v31 }
 0x23d   : > { %v517_v36 = vpop.f32.mrf.mxu3 }
 0x23e   : > { %v528_v35 = vsel %vm527_vm6, %v904_v27, %v524_v33 }
 0x23f   : > { %v533_v37 = vsel %vm530_vm7, %v532_v34, %v528_v35 }
 0x240   : > { %v534_v38 = vmul.f32 %v533_v37, %v517_v36 }
 0x242   : > { %811 = vmatmul.msk.f32.vlgmr.msrb.gmra.mxu0 %vm460_vm2, %v534_v38 }
 0x2be   : > { %566 = sbr.rel (%p812_p1) target bundleno = 750 (0x2ee), region = 52 }
 0x2bf   : > { %v558_v40 = vpop.f32.mrf.mxu0 }
 0x2c0   : > { %v561_v41 = vadd.f32 %v558_v40, %v535_v39 }
 0x2c2   : > { %562 = vst.msk [vmem:[#allocation2] sm:$0xff] %vm388_vm1, %v561_v41 }
 0x2c3   : > { %v905_v43 = vld [vmem:[%s1267_s5] ss:$0 sm:$0xff]  ;;  %v1037_v44 = vmov 8.0   ;;  %vm598_vm9 = vcmask 1040384   ;;  %vm600_vm10 = vcmask 254976  }
 0x2c4   : > { %906 = vrcp.f32 %v1037_v44 }
 0x2c9   : > { %v567_v42 = vld [vmem:[#allocation2] sm:$0xff] }
 0x2ca   : > { %v572_v45 = vadd.f32 %v905_v43, %v567_v42  ;;  %v907_v48 = vpop.eup %906 }
 0x2cb   : > { %v582_v50 = vmul.f32 8.0, %v907_v48  ;;  %vm586_vm8 = vweird.f32 %v907_v48 }
 0x2cc   : > { %573 = vst.msk [vmem:[%s1175_s23] sm:$0xff] %vm388_vm1, %v572_v45  ;;  %v574_v46 = vsel %vm388_vm1, %v572_v45, 0.0 }
 0x2cd   : > { %v575_v47 = vrot.slane %v574_v46, 4  ;;  %v583_v52 = vsub.f32 1.0, %v582_v50 }
 0x2cf   : > { %v576_v49 = vadd.f32 %v575_v47, %v574_v46  ;;  %v584_v54 = vmul.f32 %v907_v48, %v583_v52 }
 0x2d1   : > { %v577_v51 = vrot.slane %v576_v49, 2  ;;  %v585_v56 = vadd.f32 %v907_v48, %v584_v54 }
 0x2d3   : > { %v578_v53 = vadd.f32 %v577_v51, %v576_v49  ;;  %v587_v58 = vsel %vm586_vm8, %v907_v48, %v585_v56 }
 0x2d5   : > { %v579_v55 = vrot.slane %v578_v53, 1 }
 0x2d7   : > { %v580_v57 = vadd.f32 %v579_v55, %v578_v53 }
 0x2d9   : > { %v588_v59 = vmul.f32 %v587_v58, %v580_v57 }
 0x2db   : > { %v589_v60 = vsub.f32 %v572_v45, %v588_v59 }
 0x2dd   : > { %v590_v61 = vmul.f32 %v589_v60, %v589_v60 }
 0x2df   : > { %v591_v62 = vsel %vm388_vm1, %v590_v61, 0.0 }
 0x2e0   : > { %v592_v63 = vrot.slane %v591_v62, 4 }
 0x2e2   : > { %v593_v0 = vadd.f32 %v592_v63, %v591_v62 }
 0x2e4   : > { %v594_v1 = vrot.slane %v593_v0, 2 }
 0x2e6   : > { %v595_v2 = vadd.f32 %v594_v1, %v593_v0 }
 0x2e8   : > { %v596_v3 = vrot.slane %v595_v2, 1 }
 0x2ea   : > { %v597_v4 = vadd.f32 %v596_v3, %v595_v2 }
 0x2ec   : > { %v599_v5 = vsel %vm598_vm9, %v580_v57, %v597_v4 }
 0x2ed   : > { %601 = vst.msk [vmem:[%s1177_s9] sm:$0x3] %vm600_vm10, %v599_v5 }
 0x2ee PF: > { %s815_s25 = sshll.u32 %s1022_s28, 3  ;;  %s620_s30 = sshll.u32 %s1175_s23, 4  ;;  %s621_s30 = int_to_ptr.vmem [resolvable:$true] %s620_s30 }
 0x2ef   : > { %s618_s29 = scalar_lea.hbm %s1268_s6, %s815_s25  ;;  %s603_s11 = scalar_lea.sflag [#allocation4], %s1148_s18 }
 0x2f0   : > { %s622_s8 = sshll.u32 %s618_s29, 4  ;;  %s928_s20 = scalar_lea.hbm %s1268_s6, 16  ;;  %s623_s8 = int_to_ptr.hbm [resolvable:$true] %s622_s8 }
 0x2f1   : > { %s922_s12 = sshra.s32 %s623_s8, 4  ;;  %s923_s12 = int_to_ptr.hbm [resolvable:$true] %s922_s12 }
 0x2f2   : > { %s924_s14 = scalar_lea.hbm %s923_s12, 8  ;;  %p929_p6 = scmp.lt.s32.totalorder %s923_s12, %s1268_s6 }
 0x2f3   : > { %p925_p2 = scmp.ne.s32.totalorder %s923_s12, %s924_s14  ;;  %p930_p7 = scmp.lt.s32.totalorder %s928_s20, %s924_s14 }
 0x2f5   : > { %p926_p4 = pnand %p925_p2, %p1127_p3  ;;  %p931_p8 = por %p930_p7, %p929_p6 }
 0x2f7   : > { %p927_p5 = pneg %p926_p4 }
 0x2f9   : > { %p932_p10 = pnand %p931_p8, %p927_p5 }
 0x2fb   : > { %935 = shalt.err (!%p932_p10)
}
 0x2fc   : > { %823 = dma.vmem_to_hbm [thread:$0]  (%p1127_p3), %s621_s30, 128, %s623_s8, %s603_s11  }
 0x2fd   : > { %s816_s16 = sshll.u32 %s1022_s28, 1  ;;  %s634_s21 = sshll.u32 %s1177_s9, 4  ;;  %s635_s21 = int_to_ptr.vmem [resolvable:$true] %s634_s21 }
 0x2fe   : > { %s1293_s7 = sld [smem:[#allocation19_spill]]  ;;  %s608_s26 = scalar_lea.sflag [#allocation6], %s1148_s18 }
 0x304   : > { %s632_s24 = scalar_lea.hbm %s1293_s7, %s816_s16  ;;  %s956_s28 = scalar_lea.hbm %s1293_s7, 4 }
 0x305   : > { %s636_s25 = sshll.u32 %s632_s24, 4  ;;  %s637_s25 = int_to_ptr.hbm [resolvable:$true] %s636_s25 }
 0x306   : > { %s950_s27 = sshra.s32 %s637_s25, 4  ;;  %s951_s27 = int_to_ptr.hbm [resolvable:$true] %s950_s27 }
 0x307   : > { %s952_s29 = scalar_lea.hbm %s951_s27, 2  ;;  %p957_p0 = scmp.lt.s32.totalorder %s951_s27, %s1293_s7 }
 0x308   : > { %p953_p11 = scmp.ne.s32.totalorder %s951_s27, %s952_s29  ;;  %p958_p1 = scmp.lt.s32.totalorder %s956_s28, %s952_s29 }
 0x30a   : > { %p954_p12 = pnand %p953_p11, %p1127_p3  ;;  %p959_p2 = por %p958_p1, %p957_p0 }
 0x30c   : > { %p955_p13 = pneg %p954_p12 }
 0x30e   : > { %p960_p4 = pnand %p959_p2, %p955_p13 }
 0x310   : > { %963 = shalt.err (!%p960_p4)
}
 0x311   : > { %824 = dma.vmem_to_hbm [thread:$0]  (%p1127_p3), %s635_s21, 32, %s637_s25, %s608_s26  }
 0x312 PF: > { %s1294_s18 = sld [smem:[#allocation14_spill]] }
 0x313   : > { %s1295_s8 = sld [smem:[#allocation9_spill]] }
 0x318   : > { %p834_p5 = scmp.ge.s32.totalorder %s1294_s18, 2 }
 0x319   : > { %s648_s17 = sand.u32 1, %s1295_s8  }
 0x31a   : > { %p828_p6 = pnand %p834_p5, %p1137_p9  ;;  %s649_s19 = scalar_lea.sflag [#allocation4], %s648_s17 }
 0x31c   : > { %p829_p7 = pneg %p828_p6 }
 0x31e   : > { %997 = dma.done.wait (%p829_p7), %s649_s19, 128  }
 0x31f   : > { %999 = vsyncadd (%p829_p7), %s649_s19, 4294967168  ;;  %s659_s20 = scalar_lea.sflag [#allocation6], %s648_s17 }
 0x320   : > { %1001 = dma.done.wait (%p829_p7), %s659_s20, 32  }
 0x321   : > { %1003 = vsyncadd (%p829_p7), %s659_s20, 4294967264  ;;  %s24_s8 = sadd.s32 1, %s1294_s18   ;;  %s1297_s24 = sld [smem:[#allocation10_spill]] }
 0x322   : > { %p21_p8 = scmp.ge.s32.totalorder %s24_s8, 6   ;;  %s1298_s25 = sld [smem:[#allocation11_spill]] }
 0x323   : > { %s1299_s26 = sld [smem:[#allocation18_spill]] }
 0x324   : > { %s1300_s27 = sld [smem:[#allocation12_spill]]  ;;  %23 = sbr.rel (!%p21_p8) target bundleno = 9 (0x9), region = 116 }
 0x325   : > { %s1301_s28 = sld [smem:[#allocation13_spill]] }
 0x326   : > { %s1302_s29 = sld [smem:[#allocation15_spill]] }
 0x327   : > { %s1303_s30 = sld [smem:[#allocation16_spill]] }
 0x329   :  { %665 = vsyncpa [#allocation4], 1 }
 0x32a   :  { %667 = vsyncpa [#allocation4 + $0x1], 1 }
 0x32b   :  { %668 = vsyncpa [#allocation6], 1 }
 0x32c   :  { %670 = vsyncpa [#allocation6 + $0x1], 1 }

</bundles_post_ra>
